<compile_context>
chip_gen: v5e
topology: v5e:2x2
jax: 0.10.0
libtpu: 0.0.40
codegen_flags: <defaults>
</compile_context>

<pallas_src>
import math

import jax
import jax.numpy as jnp
from jax.experimental import pallas as pl
from jax.experimental.pallas import tpu as pltpu


_TARGET_BLOCK_BYTES = 1 << 20  # ~1 MiB per x/out block (safe on every generation)


# ---------------------------------------------------------------------------
# Kernel: elementwise add of the (batch-invariant) positional signal.
#   x_ref: (bb, tl, C) or (bb, tn); s_ref: (tl, C) or (1, tn)  -> broadcasts.
# ---------------------------------------------------------------------------
def _add_signal_kernel(x_ref, s_ref, o_ref):
    o_ref[...] = x_ref[...] + s_ref[...]


# ---------------------------------------------------------------------------
# Host-side signal construction (computed once, reused for every batch/tile).
# ---------------------------------------------------------------------------
def _pos_signal(length: int, channels: int, dtype) -> jax.Array:
    half_dim = channels // 2
    if half_dim > 1:
        scale = math.log(10000.0) / float(half_dim - 1)
    else:
        # PyTorch raises ZeroDivisionError for channels in {2, 3}; use a finite
        # scale here so those degenerate widths still produce a usable signal.
        scale = 0.0
    positions = jnp.arange(length, dtype=jnp.float32)
    inv_freq = jnp.exp(jnp.arange(half_dim, dtype=jnp.float32) * (-scale))
    scaled_time = positions[:, None] * inv_freq[None, :]
    signal = jnp.concatenate([jnp.sin(scaled_time), jnp.cos(scaled_time)], axis=1)
    if channels % 2 == 1:
        signal = jnp.pad(signal, ((0, 0), (0, 1)))
    # Matches `.to(inputs)` in the PyTorch module (signal added in input dtype).
    return signal.astype(dtype)  # [L, C]


# ---------------------------------------------------------------------------
# Wrapper
# ---------------------------------------------------------------------------
@jax.jit
def positional_embedding(x: jax.Array) -> jax.Array:
    """x: [B, L, C] -> x + sinusoidal positional signal (same shape/dtype)."""
    if x.ndim != 3:
        raise ValueError("The rank of input must be 3.")
    b, length, channels = x.shape
    itemsize = jnp.dtype(x.dtype).itemsize
    pack = max(8, 32 // itemsize)  # sublane packing: 8 f32, 16 bf16, 32 int8
    signal = _pos_signal(length, channels, x.dtype)  # [L, C]

    compiler_params = pltpu.CompilerParams(
        dimension_semantics=("parallel", "parallel")
    )
    cost = pl.CostEstimate(
        flops=b * length * channels,
        transcendentals=0,
        bytes_accessed=itemsize * (2 * b + 1) * length * channels,
    )

    if channels % 128 == 0:
        # ------------------ 3-D path: channels already lane-dense.
        slab = length * channels * itemsize  # one batch row at full L
        if slab <= _TARGET_BLOCK_BYTES:
            # Small per-batch slab: keep the full (L, C) plane and fold several
            # batches into one block -> ~1 MiB DMAs, far fewer grid steps, and
            # the signal block is fetched once and reused for all of them.
            tl = length
            bb = int(min(b, max(1, _TARGET_BLOCK_BYTES // slab)))
        else:
            bb = 1
            target_rows = max(1, _TARGET_BLOCK_BYTES // (channels * itemsize))
            tl = max(pack, (target_rows // pack) * pack)
            tl = min(tl, length)
        grid = (pl.cdiv(length, tl), pl.cdiv(b, bb))  # batch is INNERMOST
        return pl.pallas_call(
            _add_signal_kernel,
            out_shape=jax.ShapeDtypeStruct((b, length, channels), x.dtype),
            grid=grid,
            in_specs=[
                pl.BlockSpec((bb, tl, channels), lambda j, i: (i, j, 0)),
                # Index depends only on the outer L-tile axis -> DMA skipped on
                # every consecutive (innermost) batch step.
                pl.BlockSpec((tl, channels), lambda j, i: (j, 0)),
            ],
            out_specs=pl.BlockSpec((bb, tl, channels), lambda j, i: (i, j, 0)),
            compiler_params=compiler_params,
            cost_estimate=cost,
        )(x, signal)

    # ------------------ Lane-dense path (C % 128 != 0): fold (L, C) into one
    # last dim so stores are unmasked even for small C, and block several
    # batch ROWS per step so the sublane dim is dense (no (1, tn) blocks).
    n = length * channels
    x2 = x.reshape(b, n)
    sig2 = signal.reshape(1, n)

    bb = b if b <= pack else pack
    budget = max(128, _TARGET_BLOCK_BYTES // (bb * itemsize))
    if n <= budget:
        tn = n  # block equals full dim -> no divisibility constraint
    else:
        tn = max(128, (budget // 128) * 128)
    grid = (pl.cdiv(n, tn), pl.cdiv(b, bb))  # batch is INNERMOST

    out2 = pl.pallas_call(
        _add_signal_kernel,
        out_shape=jax.ShapeDtypeStruct((b, n), x.dtype),
        grid=grid,
        in_specs=[
            pl.BlockSpec((bb, tn), lambda j, i: (i, j)),
            # Signal block index is batch-invariant -> fetched once per N-tile.
            pl.BlockSpec((1, tn), lambda j, i: (0, j)),
        ],
        out_specs=pl.BlockSpec((bb, tn), lambda j, i: (i, j)),
        compiler_params=compiler_params,
        cost_estimate=cost,
    )(x2, sig2)
    return out2.reshape(b, length, channels)


# ---------------------------------------------------------------------------
# Pure-JAX reference mirroring the PyTorch forward.
# ---------------------------------------------------------------------------
def _reference(x: jax.Array) -> jax.Array:
    _, length, channels = x.shape
    signal = _pos_signal(length, channels, x.dtype)
    return x + signal.reshape(1, length, channels)


if __name__ == "__main__":
    key = jax.random.PRNGKey(0)

    def _check(xx, atol=1e-5):
        out = positional_embedding(xx)
        jax.block_until_ready(out)
        assert out.shape == xx.shape and out.dtype == xx.dtype
        ref = _reference(xx)
        assert jnp.allclose(
            out.astype(jnp.float32), ref.astype(jnp.float32), atol=atol, rtol=1e-3
        )

    # Case 1: small C (lane-dense flatten path, sublane-dense batch blocking).
    _check(jax.random.normal(key, (2, 8, 32), dtype=jnp.float32))

    # Case 2: C multiple of 128, tiny per-batch slab (batch-fold path).
    _check(jax.random.normal(jax.random.fold_in(key, 1), (2, 16, 128), jnp.float32))

    # Case 3: odd channel count (zero-padded last column, flatten path).
    _check(jax.random.normal(jax.random.fold_in(key, 2), (1, 8, 33), jnp.float32))

    # Case 4: bf16 input, batch-fold path (16-row sublane packing).
    _check(
        jax.random.normal(jax.random.fold_in(key, 3), (3, 64, 256), jnp.bfloat16),
        atol=2e-2,
    )

    # Case 5: slab > 1 MiB -> L-tiled path with masked remainder + signal reuse
    # across the innermost batch axis.
    _check(jax.random.normal(jax.random.fold_in(key, 4), (2, 640, 512), jnp.float32))

    print("KERNEL_OK")
</pallas_src>

<mosaic_0001>
module attributes {stable_mosaic.version = 11 : i64} {
  func.func @_add_signal_kernel(%arg0: i32, %arg1: i32, %arg2: memref<2x256xf32, #tpu.memory_space<vmem>>, %arg3: memref<1x256xf32, #tpu.memory_space<vmem>>, %arg4: memref<2x256xf32, #tpu.memory_space<vmem>>) attributes {dimension_semantics = [#tpu.dimension_semantics<parallel>, #tpu.dimension_semantics<parallel>], iteration_bounds = array<i64: 1, 1>, scalar_prefetch = 0 : i64, scratch_operands = 0 : i64, tpu.core_type = #tpu.core_type<tc>, window_params = [{transform_indices = @transform_0, window_bounds = array<i64: 2, 256>}, {transform_indices = @transform_1, window_bounds = array<i64: 1, 256>}, {transform_indices = @transform_2, window_bounds = array<i64: 2, 256>}]} {
    %c0 = arith.constant 0 : index
    %c0_0 = arith.constant 0 : index
    %0 = vector.load %arg2[%c0, %c0_0] : memref<2x256xf32, #tpu.memory_space<vmem>>, vector<2x256xf32>
    %c0_1 = arith.constant 0 : index
    %c0_2 = arith.constant 0 : index
    %1 = vector.load %arg3[%c0_1, %c0_2] : memref<1x256xf32, #tpu.memory_space<vmem>>, vector<1x256xf32>
    %2 = vector.broadcast %1 : vector<1x256xf32> to vector<2x256xf32>
    %3 = arith.addf %0, %2 : vector<2x256xf32>
    %c0_3 = arith.constant 0 : index
    %c0_4 = arith.constant 0 : index
    %4 = vector.load %arg4[%c0_3, %c0_4] : memref<2x256xf32, #tpu.memory_space<vmem>>, vector<2x256xf32>
    tpu.vector_store %arg4[%c0_3, %c0_4], %3 {strides = array<i32>} : memref<2x256xf32, #tpu.memory_space<vmem>>, vector<2x256xf32>,
    return
  }
  func.func @transform_0(%arg0: i32, %arg1: i32) -> (i32, i32) {
    %c0_i32 = arith.constant 0 : i32
    return %arg1, %arg0 : i32, i32
  }
  func.func @transform_1(%arg0: i32, %arg1: i32) -> (i32, i32) {
    %c0_i32 = arith.constant 0 : i32
    %c0_i32_0 = arith.constant 0 : i32
    return %c0_i32, %arg0 : i32, i32
  }
  func.func @transform_2(%arg0: i32, %arg1: i32) -> (i32, i32) {
    %c0_i32 = arith.constant 0 : i32
    return %arg1, %arg0 : i32, i32
  }
}

</mosaic_0001>

<bundles_post_ra>
// kernel: positional_embedding.1
= control target key start
LH: loop header
LB: loop body
LE: loop exit
PB: predicated region body
PF: predicated region fallthrough
CT: control target
= control target key end

     0   :  { %vm17_vm0 = vcmask 1041408   ;;  %s50_s1 = inlined_call_operand.vmem [shape: f32[1,256], index: 1, kind: input, shape index: {}]   ;;  %s51_s0 = inlined_call_operand.vmem [shape: f32[2,256], index: 0, kind: input, shape index: {}]   ;;  %s52_s2 = inlined_call_operand.vmem [shape: f32[2,256], index: 2, kind: output, shape index: {}]  }
   0x1   :  { %v12_v0 = vld [vmem:[%s50_s1] sm:$0x3] }
   0x2   :  { %v14_v1 = vperm.slane %v12_v0, 0  ;;  %v15_v2 = vperm.slane %v12_v0, 1  ;;  %v11_v3 = vld [vmem:[%s51_s0] sm:$0xf] }
   0x4   :  { %v16_v4 = vrot.slane %v15_v2, 6 }
   0x6   :  { %v18_v5 = vsel %vm17_vm0, %v14_v1, %v16_v4 }
   0x7   :  { %v20_v6 = vadd.f32 %v18_v5, %v11_v3 }
   0x9   :  { %21 = vst [vmem:[%s52_s2] sm:$0xf] %v20_v6 }

</bundles_post_ra>
